<compile_context>
chip_gen: v5e
topology: v5e:2x2
jax: 0.10.0
libtpu: 0.0.40
codegen_flags: <defaults>
</compile_context>

<pallas_src>
import functools

import jax
import jax.numpy as jnp
from jax import lax
from jax.experimental import pallas as pl
from jax.experimental.pallas import tpu as pltpu

LANE = 128
SLAB_ROWS = 8          # one (8, 128) f32 vreg per slab
MAX_TILE_ROWS = 2048   # (2048, 128) f32 block = 1 MiB per input stream
UNROLL = 4             # inner fori_loop unroll (gives the LLO scheduler ILP)


def _dice_bce_kernel(x_ref, t_ref, acc_ref, *, n_valid, tile_rows, tiles_per_core):
    c = pl.program_id(0)          # core-parallel axis
    i = pl.program_id(1)          # sequential tile axis

    @pl.when(i == 0)
    def _init():
        acc_ref[...] = jnp.zeros_like(acc_ref)

    n_slabs = tile_rows // SLAB_ROWS
    unroll = min(UNROLL, n_slabs)
    base = (c * tiles_per_core + i) * (tile_rows * LANE)   # flat offset of this tile
    is_full = (base + tile_rows * LANE) <= n_valid

    def stats(x, t):
        # sigmoid via tanh: exact, one EUP op, no VALU divide / compare / select.
        p = 0.5 * jnp.tanh(0.5 * x) + 0.5
        # numerically stable BCE-with-logits: max(x,0) - x*t + log1p(exp(-|x|))
        bce = jnp.maximum(x, 0.0) - x * t + jnp.log1p(jnp.exp(-jnp.abs(x)))
        return p * t, p + t, bce

    def flush(carry):
        inter, pt, bce = carry
        acc_ref[0, 0] += inter     # sum(p*t)
        acc_ref[0, 1] += pt        # sum(p) + sum(t)   (merged dice denominator)
        acc_ref[0, 2] += bce       # sum(bce)

    zeros = jnp.zeros((SLAB_ROWS, LANE), jnp.float32)
    init = (zeros, zeros, zeros)

    @pl.when(is_full)
    def _full_tile():
        # Fast path: no mask arithmetic at all.
        def body(s, carry):
            inter, pt, bce = carry
            r0 = pl.multiple_of(s * SLAB_ROWS, SLAB_ROWS)
            x = x_ref[pl.ds(r0, SLAB_ROWS), :].astype(jnp.float32)
            t = t_ref[pl.ds(r0, SLAB_ROWS), :].astype(jnp.float32)
            a, b, d = stats(x, t)
            return inter + a, pt + b, bce + d

        flush(lax.fori_loop(0, n_slabs, body, init, unroll=unroll))

    @pl.when(jnp.logical_not(is_full))
    def _tail_tile():
        # Only the tile holding the ragged end (or a clamped fully-OOB
        # duplicate block) pays for the mask work.
        local = (lax.broadcasted_iota(jnp.int32, (SLAB_ROWS, LANE), 0) * LANE
                 + lax.broadcasted_iota(jnp.int32, (SLAB_ROWS, LANE), 1))

        def body(s, carry):
            inter, pt, bce = carry
            r0 = pl.multiple_of(s * SLAB_ROWS, SLAB_ROWS)
            valid = (base + r0 * LANE + local) < n_valid
            # Mask BEFORE the transcendentals so OOB garbage never reaches them.
            x = jnp.where(valid, x_ref[pl.ds(r0, SLAB_ROWS), :].astype(jnp.float32), 0.0)
            t = jnp.where(valid, t_ref[pl.ds(r0, SLAB_ROWS), :].astype(jnp.float32), 0.0)
            a, b, d = stats(x, t)
            maskf = valid.astype(jnp.float32)
            # x=0,t=0 still gives p=0.5 and bce=log(2), so (p+t) and bce must be
            # masked; p*t is already zero wherever t was masked.
            return inter + a, pt + b * maskf, bce + d * maskf

        flush(lax.fori_loop(0, n_slabs, body, init, unroll=unroll))


def _num_parallel_cores():
    """2 only on chips with two TensorCores behind one device (v4/v5p megacore,
    v7x); 1 on single-TC chips (v2/v3/v5e/v6e) so no clamped duplicate block or
    extra accumulator bank is paid there."""
    try:
        kind = jax.devices()[0].device_kind.lower().strip()
    except Exception:
        return 1
    if "v7" in kind:
        return 2
    if kind in ("tpu v4", "tpu v5", "tpu v5p"):
        return 2
    return 1


def _round_up(a, m):
    return ((a + m - 1) // m) * m


def _min_tile_rows(*dtypes):
    # Sub-32-bit dtypes pack multiple rows per sublane: keep the block a whole
    # number of native (sublane, 128) tiles (8 rows f32, 16 bf16, 32 int8).
    m = 8
    for d in dtypes:
        m = max(m, 32 // jnp.dtype(d).itemsize)
    return m


def dice_bce_loss(inputs, targets, smooth=1.0, *, max_tile_rows=MAX_TILE_ROWS):
    """DiceBCELoss.forward(inputs, targets, smooth, mode='train', distill=False)."""
    x = inputs.reshape(-1)
    t = targets.reshape(-1)
    n = int(x.shape[0])

    # Host padding only up to a lane multiple (needed for the 2-D lane-dense
    # view); the ragged tail is masked in-kernel, on the tail tile only.
    rem = n % LANE
    if rem:
        x = jnp.pad(x, (0, LANE - rem))
        t = jnp.pad(t, (0, LANE - rem))
    total_rows = x.shape[0] // LANE
    x2 = x.reshape(total_rows, LANE)
    t2 = t.reshape(total_rows, LANE)

    row_mult = _min_tile_rows(x2.dtype, t2.dtype)
    tile_rows = min(_round_up(max_tile_rows, row_mult),
                    _round_up(total_rows, row_mult))
    n_tiles = _round_up(total_rows, tile_rows) // tile_rows
    num_cores = min(_num_parallel_cores(), n_tiles)
    tiles_per_core = _round_up(n_tiles, num_cores) // num_cores
    max_block = n_tiles - 1

    def in_map(c, i):
        # Clamp fully-out-of-range logical blocks onto the last valid block;
        # their contribution is zeroed in-kernel by the tail-tile mask.
        return (jnp.minimum(c * tiles_per_core + i, max_block), 0)

    kernel = functools.partial(_dice_bce_kernel,
                               n_valid=n,
                               tile_rows=tile_rows,
                               tiles_per_core=tiles_per_core)

    partials = pl.pallas_call(
        kernel,
        out_shape=jax.ShapeDtypeStruct((num_cores, 3, SLAB_ROWS, LANE), jnp.float32),
        grid_spec=pltpu.PrefetchScalarGridSpec(
            num_scalar_prefetch=0,
            grid=(num_cores, tiles_per_core),
            in_specs=[
                pl.BlockSpec((tile_rows, LANE), in_map),
                pl.BlockSpec((tile_rows, LANE), in_map),
            ],
            out_specs=pl.BlockSpec((1, 3, SLAB_ROWS, LANE), lambda c, i: (c, 0, 0, 0)),
        ),
        compiler_params=pltpu.CompilerParams(
            dimension_semantics=("parallel", "arbitrary")),
    )(x2, t2)

    # Tiny final reduction + nonlinear dice/BCE combination done once, outside
    # the kernel (partials are only num_cores * 3 * 8 * 128 floats).
    sums = jnp.sum(partials, axis=(0, 2, 3))     # [sum(p*t), sum(p)+sum(t), sum(bce)]
    inter, denom, sbce = sums[0], sums[1], sums[2]
    dice = 1.0 - (2.0 * inter + smooth) / (denom + smooth)
    return sbce / n + dice


def _reference(inputs, targets, smooth=1.0):
    x = inputs.reshape(-1).astype(jnp.float32)
    t = targets.reshape(-1).astype(jnp.float32)
    p = jax.nn.sigmoid(x)
    inter = jnp.sum(p * t)
    dice = 1.0 - (2.0 * inter + smooth) / (jnp.sum(p) + jnp.sum(t) + smooth)
    bce = jnp.mean(jnp.maximum(x, 0.0) - x * t + jnp.log1p(jnp.exp(-jnp.abs(x))))
    return bce + dice


if __name__ == "__main__":
    key = jax.random.PRNGKey(0)
    k1, k2, k3, k4, k5, k6 = jax.random.split(key, 6)

    # 1) Segmentation-head style inputs: NCHW logits + binary mask (full tile path).
    B, C, H, W = 2, 4, 16, 16
    inputs = jax.random.normal(k1, (B, C, H, W), dtype=jnp.float32) * 2.0
    targets = (jax.random.uniform(k2, (B, C, H, W)) > 0.5).astype(jnp.float32)
    loss = jax.block_until_ready(dice_bce_loss(inputs, targets, smooth=1.0))
    ref = _reference(inputs, targets, smooth=1.0)
    assert jnp.allclose(loss, ref, rtol=1e-4, atol=1e-4), (loss, ref)

    # 2) Ragged shape: exercises the lane-pad + in-kernel tail-mask path.
    inputs2 = jax.random.normal(k3, (1, 3, 10, 10), dtype=jnp.float32) * 2.0
    targets2 = (jax.random.uniform(k4, (1, 3, 10, 10)) > 0.5).astype(jnp.float32)
    loss2 = jax.block_until_ready(dice_bce_loss(inputs2, targets2, smooth=1.0))
    ref2 = _reference(inputs2, targets2, smooth=1.0)
    assert jnp.allclose(loss2, ref2, rtol=1e-4, atol=1e-4), (loss2, ref2)

    # 3) Force tiny tiles to exercise the multi-tile full+tail accumulation and
    #    the core-axis split (still a small shape).
    inputs3 = jax.random.normal(k5, (1, 3, 20, 20), dtype=jnp.float32) * 2.0
    targets3 = (jax.random.uniform(k6, (1, 3, 20, 20)) > 0.5).astype(jnp.float32)
    loss3 = jax.block_until_ready(
        dice_bce_loss(inputs3, targets3, smooth=1.0, max_tile_rows=8))
    ref3 = _reference(inputs3, targets3, smooth=1.0)
    assert jnp.allclose(loss3, ref3, rtol=1e-4, atol=1e-4), (loss3, ref3)

    print("KERNEL_OK")
</pallas_src>

<mosaic_0001>
module attributes {stable_mosaic.version = 11 : i64} {
  func.func @_dice_bce_kernel(%arg0: i32, %arg1: i32, %arg2: memref<16x128xf32, #tpu.memory_space<vmem>>, %arg3: memref<16x128xf32, #tpu.memory_space<vmem>>, %arg4: memref<1x3x8x128xf32, #tpu.memory_space<vmem>>) attributes {dimension_semantics = [#tpu.dimension_semantics<parallel>, #tpu.dimension_semantics<arbitrary>], iteration_bounds = array<i64: 1, 1>, scalar_prefetch = 0 : i64, scratch_operands = 0 : i64, tpu.core_type = #tpu.core_type<tc>, window_params = [{transform_indices = @transform_0, window_bounds = array<i64: 16, 128>}, {transform_indices = @transform_1, window_bounds = array<i64: 16, 128>}, {transform_indices = @transform_2, window_bounds = array<i64: 1, 3, 8, 128>}]} {
    %c0_i32 = arith.constant 0 : i32
    %0 = arith.cmpi eq, %arg1, %c0_i32 : i32
    %1 = arith.extui %0 : i1 to i32
    %c0_i32_0 = arith.constant 0 : i32
    %2 = arith.cmpi ne, %1, %c0_i32_0 : i32
    scf.if %2 {
      %cst_5 = arith.constant 0.000000e+00 : f32
      %14 = vector.broadcast %cst_5 : f32 to vector<1x3x8x128xf32>
      %c0 = arith.constant 0 : index
      %c0_6 = arith.constant 0 : index
      %c0_7 = arith.constant 0 : index
      %c0_8 = arith.constant 0 : index
      %15 = vector.load %arg4[%c0, %c0_6, %c0_7, %c0_8] : memref<1x3x8x128xf32, #tpu.memory_space<vmem>>, vector<1x3x8x128xf32>
      tpu.vector_store %arg4[%c0, %c0_6, %c0_7, %c0_8], %14 {strides = array<i32>} : memref<1x3x8x128xf32, #tpu.memory_space<vmem>>, vector<1x3x8x128xf32>,
    } else {
    }
    %c1_i32 = arith.constant 1 : i32
    %3 = arith.muli %arg0, %c1_i32 : i32
    %4 = arith.addi %3, %arg1 : i32
    %c2048_i32 = arith.constant 2048 : i32
    %5 = arith.muli %4, %c2048_i32 : i32
    %c2048_i32_1 = arith.constant 2048 : i32
    %6 = arith.addi %5, %c2048_i32_1 : i32
    %c2048_i32_2 = arith.constant 2048 : i32
    %7 = arith.cmpi sle, %6, %c2048_i32_2 : i32
    %cst = arith.constant 0.000000e+00 : f32
    %8 = vector.broadcast %cst : f32 to vector<8x128xf32>
    %9 = arith.extui %7 : i1 to i32
    %c0_i32_3 = arith.constant 0 : i32
    %10 = arith.cmpi ne, %9, %c0_i32_3 : i32
    scf.if %10 {
      %c0_i32_5 = arith.constant 0 : i32
      %c8_i32 = arith.constant 8 : i32
      %14 = arith.muli %c0_i32_5, %c8_i32 : i32
      %15 = tpu.assume_multiple %14, 8 : i32
      %16 = arith.index_cast %15 : i32 to index
      %c0 = arith.constant 0 : index
      %17 = vector.load %arg2[%16, %c0] : memref<16x128xf32, #tpu.memory_space<vmem>>, vector<8x128xf32>
      %18 = arith.index_cast %15 : i32 to index
      %c0_6 = arith.constant 0 : index
      %19 = vector.load %arg3[%18, %c0_6] : memref<16x128xf32, #tpu.memory_space<vmem>>, vector<8x128xf32>
      %cst_7 = arith.constant 5.000000e-01 : f32
      %20 = vector.broadcast %cst_7 : f32 to vector<8x128xf32>
      %21 = arith.mulf %20, %17 : vector<8x128xf32>
      %22 = math.tanh %21 : vector<8x128xf32>
      %cst_8 = arith.constant 5.000000e-01 : f32
      %23 = vector.broadcast %cst_8 : f32 to vector<8x128xf32>
      %24 = arith.mulf %23, %22 : vector<8x128xf32>
      %cst_9 = arith.constant 5.000000e-01 : f32
      %25 = vector.broadcast %cst_9 : f32 to vector<8x128xf32>
      %26 = arith.addf %24, %25 : vector<8x128xf32>
      %cst_10 = arith.constant 0.000000e+00 : f32
      %27 = vector.broadcast %cst_10 : f32 to vector<8x128xf32>
      %28 = arith.maximumf %17, %27 : vector<8x128xf32>
      %29 = arith.mulf %17, %19 : vector<8x128xf32>
      %30 = arith.subf %28, %29 : vector<8x128xf32>
      %31 = math.absf %17 : vector<8x128xf32>
      %cst_11 = arith.constant 0.000000e+00 : f32
      %32 = vector.broadcast %cst_11 : f32 to vector<8x128xf32>
      %33 = arith.subf %32, %31 : vector<8x128xf32>
      %34 = math.exp %33 : vector<8x128xf32>
      %35 = math.log1p %34 : vector<8x128xf32>
      %36 = arith.addf %30, %35 : vector<8x128xf32>
      %37 = arith.mulf %26, %19 : vector<8x128xf32>
      %38 = arith.addf %26, %19 : vector<8x128xf32>
      %39 = arith.addf %8, %37 : vector<8x128xf32>
      %40 = arith.addf %8, %38 : vector<8x128xf32>
      %41 = arith.addf %8, %36 : vector<8x128xf32>
      %c1_i32_12 = arith.constant 1 : i32
      %c8_i32_13 = arith.constant 8 : i32
      %42 = arith.muli %c1_i32_12, %c8_i32_13 : i32
      %43 = tpu.assume_multiple %42, 8 : i32
      %44 = arith.index_cast %43 : i32 to index
      %c0_14 = arith.constant 0 : index
      %45 = vector.load %arg2[%44, %c0_14] : memref<16x128xf32, #tpu.memory_space<vmem>>, vector<8x128xf32>
      %46 = arith.index_cast %43 : i32 to index
      %c0_15 = arith.constant 0 : index
      %47 = vector.load %arg3[%46, %c0_15] : memref<16x128xf32, #tpu.memory_space<vmem>>, vector<8x128xf32>
      %cst_16 = arith.constant 5.000000e-01 : f32
      %48 = vector.broadcast %cst_16 : f32 to vector<8x128xf32>
      %49 = arith.mulf %48, %45 : vector<8x128xf32>
      %50 = math.tanh %49 : vector<8x128xf32>
      %cst_17 = arith.constant 5.000000e-01 : f32
      %51 = vector.broadcast %cst_17 : f32 to vector<8x128xf32>
      %52 = arith.mulf %51, %50 : vector<8x128xf32>
      %cst_18 = arith.constant 5.000000e-01 : f32
      %53 = vector.broadcast %cst_18 : f32 to vector<8x128xf32>
      %54 = arith.addf %52, %53 : vector<8x128xf32>
      %cst_19 = arith.constant 0.000000e+00 : f32
      %55 = vector.broadcast %cst_19 : f32 to vector<8x128xf32>
      %56 = arith.maximumf %45, %55 : vector<8x128xf32>
      %57 = arith.mulf %45, %47 : vector<8x128xf32>
      %58 = arith.subf %56, %57 : vector<8x128xf32>
      %59 = math.absf %45 : vector<8x128xf32>
      %cst_20 = arith.constant 0.000000e+00 : f32
      %60 = vector.broadcast %cst_20 : f32 to vector<8x128xf32>
      %61 = arith.subf %60, %59 : vector<8x128xf32>
      %62 = math.exp %61 : vector<8x128xf32>
      %63 = math.log1p %62 : vector<8x128xf32>
      %64 = arith.addf %58, %63 : vector<8x128xf32>
      %65 = arith.mulf %54, %47 : vector<8x128xf32>
      %66 = arith.addf %54, %47 : vector<8x128xf32>
      %67 = arith.addf %39, %65 : vector<8x128xf32>
      %68 = arith.addf %40, %66 : vector<8x128xf32>
      %69 = arith.addf %41, %64 : vector<8x128xf32>
      %c2_i32 = arith.constant 2 : i32
      %c0_21 = arith.constant 0 : index
      %c0_22 = arith.constant 0 : index
      %c0_23 = arith.constant 0 : index
      %c0_24 = arith.constant 0 : index
      %70 = vector.load %arg4[%c0_21, %c0_22, %c0_23, %c0_24] : memref<1x3x8x128xf32, #tpu.memory_space<vmem>>, vector<1x1x8x128xf32>
      %71 = vector.shape_cast %70 : vector<1x1x8x128xf32> to vector<8x128xf32>
      %72 = arith.addf %71, %67 : vector<8x128xf32>
      %c0_25 = arith.constant 0 : index
      %c0_26 = arith.constant 0 : index
      %c0_27 = arith.constant 0 : index
      %c0_28 = arith.constant 0 : index
      %73 = vector.load %arg4[%c0_25, %c0_26, %c0_27, %c0_28] : memref<1x3x8x128xf32, #tpu.memory_space<vmem>>, vector<1x1x8x128xf32>
      %74 = vector.shape_cast %73 : vector<1x1x8x128xf32> to vector<8x128xf32>
      %75 = vector.shape_cast %72 : vector<8x128xf32> to vector<1x1x8x128xf32>
      tpu.vector_store %arg4[%c0_25, %c0_26, %c0_27, %c0_28], %75 {strides = array<i32>} : memref<1x3x8x128xf32, #tpu.memory_space<vmem>>, vector<1x1x8x128xf32>,
      %c0_29 = arith.constant 0 : index
      %c1 = arith.constant 1 : index
      %c0_30 = arith.constant 0 : index
      %c0_31 = arith.constant 0 : index
      %76 = vector.load %arg4[%c0_29, %c1, %c0_30, %c0_31] : memref<1x3x8x128xf32, #tpu.memory_space<vmem>>, vector<1x1x8x128xf32>
      %77 = vector.shape_cast %76 : vector<1x1x8x128xf32> to vector<8x128xf32>
      %78 = arith.addf %77, %68 : vector<8x128xf32>
      %c0_32 = arith.constant 0 : index
      %c1_33 = arith.constant 1 : index
      %c0_34 = arith.constant 0 : index
      %c0_35 = arith.constant 0 : index
      %79 = vector.load %arg4[%c0_32, %c1_33, %c0_34, %c0_35] : memref<1x3x8x128xf32, #tpu.memory_space<vmem>>, vector<1x1x8x128xf32>
      %80 = vector.shape_cast %79 : vector<1x1x8x128xf32> to vector<8x128xf32>
      %81 = vector.shape_cast %78 : vector<8x128xf32> to vector<1x1x8x128xf32>
      tpu.vector_store %arg4[%c0_32, %c1_33, %c0_34, %c0_35], %81 {strides = array<i32>} : memref<1x3x8x128xf32, #tpu.memory_space<vmem>>, vector<1x1x8x128xf32>,
      %c0_36 = arith.constant 0 : index
      %c2 = arith.constant 2 : index
      %c0_37 = arith.constant 0 : index
      %c0_38 = arith.constant 0 : index
      %82 = vector.load %arg4[%c0_36, %c2, %c0_37, %c0_38] : memref<1x3x8x128xf32, #tpu.memory_space<vmem>>, vector<1x1x8x128xf32>
      %83 = vector.shape_cast %82 : vector<1x1x8x128xf32> to vector<8x128xf32>
      %84 = arith.addf %83, %69 : vector<8x128xf32>
      %c0_39 = arith.constant 0 : index
      %c2_40 = arith.constant 2 : index
      %c0_41 = arith.constant 0 : index
      %c0_42 = arith.constant 0 : index
      %85 = vector.load %arg4[%c0_39, %c2_40, %c0_41, %c0_42] : memref<1x3x8x128xf32, #tpu.memory_space<vmem>>, vector<1x1x8x128xf32>
      %86 = vector.shape_cast %85 : vector<1x1x8x128xf32> to vector<8x128xf32>
      %87 = vector.shape_cast %84 : vector<8x128xf32> to vector<1x1x8x128xf32>
      tpu.vector_store %arg4[%c0_39, %c2_40, %c0_41, %c0_42], %87 {strides = array<i32>} : memref<1x3x8x128xf32, #tpu.memory_space<vmem>>, vector<1x1x8x128xf32>,
    } else {
    }
    %true = arith.constant true
    %11 = arith.xori %7, %true : i1
    %12 = arith.extui %11 : i1 to i32
    %c0_i32_4 = arith.constant 0 : i32
    %13 = arith.cmpi ne, %12, %c0_i32_4 : i32
    scf.if %13 {
      %14 = tpu.iota {dimensions = array<i32: 0>} : vector<8x128xi32>
      %c128_i32 = arith.constant 128 : i32
      %15 = vector.broadcast %c128_i32 : i32 to vector<8x128xi32>
      %16 = arith.muli %14, %15 : vector<8x128xi32>
      %17 = tpu.iota {dimensions = array<i32: 1>} : vector<8x128xi32>
      %18 = arith.addi %16, %17 : vector<8x128xi32>
      %c0_i32_5 = arith.constant 0 : i32
      %c8_i32 = arith.constant 8 : i32
      %19 = arith.muli %c0_i32_5, %c8_i32 : i32
      %20 = tpu.assume_multiple %19, 8 : i32
      %c128_i32_6 = arith.constant 128 : i32
      %21 = arith.muli %20, %c128_i32_6 : i32
      %22 = arith.addi %5, %21 : i32
      %23 = vector.broadcast %22 : i32 to vector<8x128xi32>
      %24 = arith.addi %23, %18 : vector<8x128xi32>
      %c2048_i32_7 = arith.constant 2048 : i32
      %25 = vector.broadcast %c2048_i32_7 : i32 to vector<8x128xi32>
      %26 = arith.cmpi slt, %24, %25 : vector<8x128xi32>
      %27 = arith.index_cast %20 : i32 to index
      %c0 = arith.constant 0 : index
      %28 = vector.load %arg2[%27, %c0] : memref<16x128xf32, #tpu.memory_space<vmem>>, vector<8x128xf32>
      %cst_8 = arith.constant 0.000000e+00 : f32
      %29 = vector.broadcast %cst_8 : f32 to vector<8x128xf32>
      %30 = arith.select %26, %28, %29 : vector<8x128xi1>, vector<8x128xf32>
      %31 = arith.index_cast %20 : i32 to index
      %c0_9 = arith.constant 0 : index
      %32 = vector.load %arg3[%31, %c0_9] : memref<16x128xf32, #tpu.memory_space<vmem>>, vector<8x128xf32>
      %cst_10 = arith.constant 0.000000e+00 : f32
      %33 = vector.broadcast %cst_10 : f32 to vector<8x128xf32>
      %34 = arith.select %26, %32, %33 : vector<8x128xi1>, vector<8x128xf32>
      %cst_11 = arith.constant 5.000000e-01 : f32
      %35 = vector.broadcast %cst_11 : f32 to vector<8x128xf32>
      %36 = arith.mulf %35, %30 : vector<8x128xf32>
      %37 = math.tanh %36 : vector<8x128xf32>
      %cst_12 = arith.constant 5.000000e-01 : f32
      %38 = vector.broadcast %cst_12 : f32 to vector<8x128xf32>
      %39 = arith.mulf %38, %37 : vector<8x128xf32>
      %cst_13 = arith.constant 5.000000e-01 : f32
      %40 = vector.broadcast %cst_13 : f32 to vector<8x128xf32>
      %41 = arith.addf %39, %40 : vector<8x128xf32>
      %cst_14 = arith.constant 0.000000e+00 : f32
      %42 = vector.broadcast %cst_14 : f32 to vector<8x128xf32>
      %43 = arith.maximumf %30, %42 : vector<8x128xf32>
      %44 = arith.mulf %30, %34 : vector<8x128xf32>
      %45 = arith.subf %43, %44 : vector<8x128xf32>
      %46 = math.absf %30 : vector<8x128xf32>
      %cst_15 = arith.constant 0.000000e+00 : f32
      %47 = vector.broadcast %cst_15 : f32 to vector<8x128xf32>
      %48 = arith.subf %47, %46 : vector<8x128xf32>
      %49 = math.exp %48 : vector<8x128xf32>
      %50 = math.log1p %49 : vector<8x128xf32>
      %51 = arith.addf %45, %50 : vector<8x128xf32>
      %52 = arith.mulf %41, %34 : vector<8x128xf32>
      %53 = arith.addf %41, %34 : vector<8x128xf32>
      %54 = arith.extui %26 : vector<8x128xi1> to vector<8x128xi32>
      %55 = arith.sitofp %54 : vector<8x128xi32> to vector<8x128xf32>
      %56 = arith.addf %8, %52 : vector<8x128xf32>
      %57 = arith.mulf %53, %55 : vector<8x128xf32>
      %58 = arith.addf %8, %57 : vector<8x128xf32>
      %59 = arith.mulf %51, %55 : vector<8x128xf32>
      %60 = arith.addf %8, %59 : vector<8x128xf32>
      %c1_i32_16 = arith.constant 1 : i32
      %c8_i32_17 = arith.constant 8 : i32
      %61 = arith.muli %c1_i32_16, %c8_i32_17 : i32
      %62 = tpu.assume_multiple %61, 8 : i32
      %c128_i32_18 = arith.constant 128 : i32
      %63 = arith.muli %62, %c128_i32_18 : i32
      %64 = arith.addi %5, %63 : i32
      %65 = vector.broadcast %64 : i32 to vector<8x128xi32>
      %66 = arith.addi %65, %18 : vector<8x128xi32>
      %c2048_i32_19 = arith.constant 2048 : i32
      %67 = vector.broadcast %c2048_i32_19 : i32 to vector<8x128xi32>
      %68 = arith.cmpi slt, %66, %67 : vector<8x128xi32>
      %69 = arith.index_cast %62 : i32 to index
      %c0_20 = arith.constant 0 : index
      %70 = vector.load %arg2[%69, %c0_20] : memref<16x128xf32, #tpu.memory_space<vmem>>, vector<8x128xf32>
      %cst_21 = arith.constant 0.000000e+00 : f32
      %71 = vector.broadcast %cst_21 : f32 to vector<8x128xf32>
      %72 = arith.select %68, %70, %71 : vector<8x128xi1>, vector<8x128xf32>
      %73 = arith.index_cast %62 : i32 to index
      %c0_22 = arith.constant 0 : index
      %74 = vector.load %arg3[%73, %c0_22] : memref<16x128xf32, #tpu.memory_space<vmem>>, vector<8x128xf32>
      %cst_23 = arith.constant 0.000000e+00 : f32
      %75 = vector.broadcast %cst_23 : f32 to vector<8x128xf32>
      %76 = arith.select %68, %74, %75 : vector<8x128xi1>, vector<8x128xf32>
      %cst_24 = arith.constant 5.000000e-01 : f32
      %77 = vector.broadcast %cst_24 : f32 to vector<8x128xf32>
      %78 = arith.mulf %77, %72 : vector<8x128xf32>
      %79 = math.tanh %78 : vector<8x128xf32>
      %cst_25 = arith.constant 5.000000e-01 : f32
      %80 = vector.broadcast %cst_25 : f32 to vector<8x128xf32>
      %81 = arith.mulf %80, %79 : vector<8x128xf32>
      %cst_26 = arith.constant 5.000000e-01 : f32
      %82 = vector.broadcast %cst_26 : f32 to vector<8x128xf32>
      %83 = arith.addf %81, %82 : vector<8x128xf32>
      %cst_27 = arith.constant 0.000000e+00 : f32
      %84 = vector.broadcast %cst_27 : f32 to vector<8x128xf32>
      %85 = arith.maximumf %72, %84 : vector<8x128xf32>
      %86 = arith.mulf %72, %76 : vector<8x128xf32>
      %87 = arith.subf %85, %86 : vector<8x128xf32>
      %88 = math.absf %72 : vector<8x128xf32>
      %cst_28 = arith.constant 0.000000e+00 : f32
      %89 = vector.broadcast %cst_28 : f32 to vector<8x128xf32>
      %90 = arith.subf %89, %88 : vector<8x128xf32>
      %91 = math.exp %90 : vector<8x128xf32>
      %92 = math.log1p %91 : vector<8x128xf32>
      %93 = arith.addf %87, %92 : vector<8x128xf32>
      %94 = arith.mulf %83, %76 : vector<8x128xf32>
      %95 = arith.addf %83, %76 : vector<8x128xf32>
      %96 = arith.extui %68 : vector<8x128xi1> to vector<8x128xi32>
      %97 = arith.sitofp %96 : vector<8x128xi32> to vector<8x128xf32>
      %98 = arith.addf %56, %94 : vector<8x128xf32>
      %99 = arith.mulf %95, %97 : vector<8x128xf32>
      %100 = arith.addf %58, %99 : vector<8x128xf32>
      %101 = arith.mulf %93, %97 : vector<8x128xf32>
      %102 = arith.addf %60, %101 : vector<8x128xf32>
      %c2_i32 = arith.constant 2 : i32
      %c0_29 = arith.constant 0 : index
      %c0_30 = arith.constant 0 : index
      %c0_31 = arith.constant 0 : index
      %c0_32 = arith.constant 0 : index
      %103 = vector.load %arg4[%c0_29, %c0_30, %c0_31, %c0_32] : memref<1x3x8x128xf32, #tpu.memory_space<vmem>>, vector<1x1x8x128xf32>
      %104 = vector.shape_cast %103 : vector<1x1x8x128xf32> to vector<8x128xf32>
      %105 = arith.addf %104, %98 : vector<8x128xf32>
      %c0_33 = arith.constant 0 : index
      %c0_34 = arith.constant 0 : index
      %c0_35 = arith.constant 0 : index
      %c0_36 = arith.constant 0 : index
      %106 = vector.load %arg4[%c0_33, %c0_34, %c0_35, %c0_36] : memref<1x3x8x128xf32, #tpu.memory_space<vmem>>, vector<1x1x8x128xf32>
      %107 = vector.shape_cast %106 : vector<1x1x8x128xf32> to vector<8x128xf32>
      %108 = vector.shape_cast %105 : vector<8x128xf32> to vector<1x1x8x128xf32>
      tpu.vector_store %arg4[%c0_33, %c0_34, %c0_35, %c0_36], %108 {strides = array<i32>} : memref<1x3x8x128xf32, #tpu.memory_space<vmem>>, vector<1x1x8x128xf32>,
      %c0_37 = arith.constant 0 : index
      %c1 = arith.constant 1 : index
      %c0_38 = arith.constant 0 : index
      %c0_39 = arith.constant 0 : index
      %109 = vector.load %arg4[%c0_37, %c1, %c0_38, %c0_39] : memref<1x3x8x128xf32, #tpu.memory_space<vmem>>, vector<1x1x8x128xf32>
      %110 = vector.shape_cast %109 : vector<1x1x8x128xf32> to vector<8x128xf32>
      %111 = arith.addf %110, %100 : vector<8x128xf32>
      %c0_40 = arith.constant 0 : index
      %c1_41 = arith.constant 1 : index
      %c0_42 = arith.constant 0 : index
      %c0_43 = arith.constant 0 : index
      %112 = vector.load %arg4[%c0_40, %c1_41, %c0_42, %c0_43] : memref<1x3x8x128xf32, #tpu.memory_space<vmem>>, vector<1x1x8x128xf32>
      %113 = vector.shape_cast %112 : vector<1x1x8x128xf32> to vector<8x128xf32>
      %114 = vector.shape_cast %111 : vector<8x128xf32> to vector<1x1x8x128xf32>
      tpu.vector_store %arg4[%c0_40, %c1_41, %c0_42, %c0_43], %114 {strides = array<i32>} : memref<1x3x8x128xf32, #tpu.memory_space<vmem>>, vector<1x1x8x128xf32>,
      %c0_44 = arith.constant 0 : index
      %c2 = arith.constant 2 : index
      %c0_45 = arith.constant 0 : index
      %c0_46 = arith.constant 0 : index
      %115 = vector.load %arg4[%c0_44, %c2, %c0_45, %c0_46] : memref<1x3x8x128xf32, #tpu.memory_space<vmem>>, vector<1x1x8x128xf32>
      %116 = vector.shape_cast %115 : vector<1x1x8x128xf32> to vector<8x128xf32>
      %117 = arith.addf %116, %102 : vector<8x128xf32>
      %c0_47 = arith.constant 0 : index
      %c2_48 = arith.constant 2 : index
      %c0_49 = arith.constant 0 : index
      %c0_50 = arith.constant 0 : index
      %118 = vector.load %arg4[%c0_47, %c2_48, %c0_49, %c0_50] : memref<1x3x8x128xf32, #tpu.memory_space<vmem>>, vector<1x1x8x128xf32>
      %119 = vector.shape_cast %118 : vector<1x1x8x128xf32> to vector<8x128xf32>
      %120 = vector.shape_cast %117 : vector<8x128xf32> to vector<1x1x8x128xf32>
      tpu.vector_store %arg4[%c0_47, %c2_48, %c0_49, %c0_50], %120 {strides = array<i32>} : memref<1x3x8x128xf32, #tpu.memory_space<vmem>>, vector<1x1x8x128xf32>,
    } else {
    }
    return
  }
  func.func @transform_0(%arg0: i32, %arg1: i32) -> (i32, i32) {
    %c1_i32 = arith.constant 1 : i32
    %0 = arith.muli %arg0, %c1_i32 : i32
    %1 = arith.addi %0, %arg1 : i32
    %c0_i32 = arith.constant 0 : i32
    %2 = arith.minsi %1, %c0_i32 : i32
    %c0_i32_0 = arith.constant 0 : i32
    %c0_i32_1 = arith.constant 0 : i32
    return %2, %c0_i32_0 : i32, i32
  }
  func.func @transform_1(%arg0: i32, %arg1: i32) -> (i32, i32) {
    %c1_i32 = arith.constant 1 : i32
    %0 = arith.muli %arg0, %c1_i32 : i32
    %1 = arith.addi %0, %arg1 : i32
    %c0_i32 = arith.constant 0 : i32
    %2 = arith.minsi %1, %c0_i32 : i32
    %c0_i32_0 = arith.constant 0 : i32
    %c0_i32_1 = arith.constant 0 : i32
    return %2, %c0_i32_0 : i32, i32
  }
  func.func @transform_2(%arg0: i32, %arg1: i32) -> (i32, i32, i32, i32) {
    %c0_i32 = arith.constant 0 : i32
    %c0_i32_0 = arith.constant 0 : i32
    %c0_i32_1 = arith.constant 0 : i32
    %c0_i32_2 = arith.constant 0 : i32
    return %arg0, %c0_i32, %c0_i32_0, %c0_i32_1 : i32, i32, i32, i32
  }
}

</mosaic_0001>

<bundles_post_ra>
// kernel: tpu_custom_call.1
= control target key start
LH: loop header
LB: loop body
LE: loop exit
PB: predicated region body
PF: predicated region fallthrough
CT: control target
= control target key end

     0   :  { %7 = vsyncpa [#allocation3], 0  ;;  %s408_s0 = inlined_call_operand.hbm [shape: f32[16,128], index: 0, kind: input, shape index: {}]   ;;  %s409_s1 = inlined_call_operand.hbm [shape: f32[16,128], index: 1, kind: input, shape index: {}]   ;;  %s410_s2 = inlined_call_operand.hbm [shape: f32[1,3,8,128], index: 2, kind: output, shape index: {}]  }
   0x1   :  { %8 = vsyncpa [#allocation6], 0 }
   0x2   :  { %9 = vsyncpa [#allocation4], 0  ;;  %s20_s11 = sshll.u32 %s408_s0, 4  ;;  %s370_s12 = smov [#allocation2]   ;;  %s21_s11 = int_to_ptr.hbm [resolvable:$true] %s20_s11 }
   0x3   :  { %s22_s13 = sshll.u32 %s370_s12, 4  ;;  %s39_s16 = sshll.u32 %s409_s1, 4  ;;  %s23_s13 = int_to_ptr.vmem [resolvable:$true] %s22_s13  ;;  %s40_s16 = int_to_ptr.hbm [resolvable:$true] %s39_s16 }
   0x4   :  { %s371_s17 = smov 128   ;;  %s372_s18 = smov 8  }
   0x5   :  { %28 = dma.hbm_to_vmem [thread:$0]  %s21_s11, 256, %s23_s13, [#allocation3], %s371_s17, %s371_s17, %s372_s18  }
   0x6   :  { %s373_s19 = smov [#allocation5]  }
   0x7   :  { %s41_s20 = sshll.u32 %s373_s19, 4  ;;  %s42_s20 = int_to_ptr.vmem [resolvable:$true] %s41_s20 }
   0x8   :  { %47 = dma.hbm_to_vmem [thread:$0]  %s40_s16, 256, %s42_s20, [#allocation6], %s371_s17, %s371_s17, %s372_s18  }
   0x9   :  { %364 = dma.done.wait [#allocation3], 256  }
   0xa   :  { %365 = vsyncadd [#allocation3], 4294967040 }
   0xb   :  { %366 = dma.done.wait [#allocation6], 256  }
   0xc   :  { %367 = vsyncadd [#allocation6], 4294967040  ;;  %v78_v0 = vld [vmem:[#allocation2] sm:$0xff]  ;;  %v107_v1 = vld [vmem:[#allocation2 + $0x8] sm:$0xff]  ;;  %s374_s0 = smov [#allocation7]   ;;  %s254_s23 = sshll.u32 %s410_s2, 4  ;;  %s255_s23 = int_to_ptr.hbm [resolvable:$true] %s254_s23 }
   0xd   :  { %v80_v2 = vmul.f32 0.5, %v78_v0  ;;  %v87_v3 = vand.u32 2147483647, %v78_v0  ;;  %v110_v4 = vmul.f32 0.5, %v107_v1  ;;  %v117_v5 = vand.u32 2147483647, %v107_v1 }
   0xe   :  { %v79_v16 = vld [vmem:[#allocation5] sm:$0xff]  ;;  %v109_v20 = vld [vmem:[#allocation5 + $0x8] sm:$0xff]  ;;  %v84_v27 = vmax.f32 %v78_v0, 0.0  ;;  %v114_v34 = vmax.f32 %v107_v1, 0.0  ;;  %s252_s1 = sshll.u32 %s374_s0, 4  ;;  %s253_s1 = int_to_ptr.vmem [resolvable:$true] %s252_s1 }
   0xf   :  { %280 = vtanh.f32 %v80_v2  ;;  %v88_v6 = vsub.f32 0.0, %v87_v3  ;;  %v118_v7 = vsub.f32 0.0, %v117_v5  ;;  %v85_v32 = vmul.f32 %v79_v16, %v78_v0 }
  0x10   :  { %282 = vtanh.f32 %v110_v4  ;;  %v115_v36 = vmul.f32 %v109_v20, %v107_v1 }
  0x11   :  { %v89_v8 = vmul.f32 1.442695, %v88_v6  ;;  %v119_v9 = vmul.f32 1.442695, %v118_v7  ;;  %v86_v40 = vsub.f32 %v84_v27, %v85_v32 }
  0x12   :  { %v116_v44 = vsub.f32 %v114_v34, %v115_v36 }
  0x13   :  { %284 = vpow2.f32 %v89_v8 }
  0x14   :  { %286 = vpow2.f32 %v119_v9 }
  0x15   :  { %v281_v10 = vpop.eup %280 }
  0x16   :  { %v283_v11 = vpop.eup %282  ;;  %v82_v12 = vmul.f32 0.5, %v281_v10 }
  0x17   :  { %v112_v13 = vmul.f32 0.5, %v283_v11 }
  0x18   :  { %v83_v14 = vadd.f32 0.5, %v82_v12 }
  0x19   :  { %v285_v15 = vpop.eup %284  ;;  %v113_v17 = vadd.f32 0.5, %v112_v13 }
  0x1a   :  { %v287_v18 = vpop.eup %286  ;;  %v101_v19 = vmul.f32 %v83_v14, %v79_v16  ;;  %v102_v21 = vadd.f32 %v83_v14, %v79_v16  ;;  %v91_v22 = vadd.f32 1.0, %v285_v15  ;;  %v94_v23 = vmul.f32 -0.5, %v285_v15 }
  0x1b   :  { %v131_v24 = vmul.f32 %v113_v17, %v109_v20  ;;  %v132_v25 = vadd.f32 %v113_v17, %v109_v20  ;;  %v121_v26 = vadd.f32 1.0, %v287_v18  ;;  %v124_v28 = vmul.f32 -0.5, %v287_v18 }
  0x1c   :  { %288 = vlog2.f32 %v91_v22  ;;  %v95_v31 = vadd.f32 1.0, %v94_v23  ;;  %v97_v33 = vand.u32 2147483647, %v285_v15  ;;  %v127_v37 = vand.u32 2147483647, %v287_v18 }
  0x1d   :  { %v133_v29 = vadd.f32 %v131_v24, %v101_v19  ;;  %v134_v30 = vadd.f32 %v132_v25, %v102_v21  ;;  %290 = vlog2.f32 %v121_v26  ;;  %v125_v35 = vadd.f32 1.0, %v124_v28 }
  0x1e   :  { %v96_v38 = vmul.f32 %v285_v15, %v95_v31  ;;  %vm98_vm0 = vcmp.lt.f32.partialorder %v97_v33, 0.0004427343  ;;  %vm128_vm1 = vcmp.lt.f32.partialorder %v127_v37, 0.0004427343 }
  0x1f   :  { %138 = vst [vmem:[#allocation7] sm:$0xff] %v133_v29  ;;  %v126_v41 = vmul.f32 %v287_v18, %v125_v35 }
  0x20   :  { %142 = vst [vmem:[#allocation7 + $0x8] sm:$0xff] %v134_v30 }
  0x22   :  { %v289_v39 = vpop.eup %288 }
  0x23   :  { %v291_v42 = vpop.eup %290  ;;  %v93_v43 = vmul.f32 0.6931472, %v289_v39 }
  0x24   :  { %v123_v45 = vmul.f32 0.6931472, %v291_v42 }
  0x25   :  { %v99_v46 = vsel %vm98_vm0, %v96_v38, %v93_v43 }
  0x26   :  { %v100_v47 = vadd.f32 %v99_v46, %v86_v40  ;;  %v129_v48 = vsel %vm128_vm1, %v126_v41, %v123_v45 }
  0x27   :  { %v130_v49 = vadd.f32 %v129_v48, %v116_v44 }
  0x29   :  { %v135_v50 = vadd.f32 %v130_v49, %v100_v47 }
  0x2b   :  { %146 = vst [vmem:[#allocation7 + $0x10] sm:$0xff] %v135_v50 }
  0x2c   :  { %260 = dma.vmem_to_hbm [thread:$0]  %s253_s1, 384, %s255_s23, [#allocation4], %s371_s17, %s371_s17, %s372_s18  }
  0x2d   :  { %368 = dma.done.wait [#allocation4], 384  }
  0x2e   :  { %369 = vsyncadd [#allocation4], 4294966912 }
  0x2f   :  { %265 = vsyncpa [#allocation3], 1 }
  0x30   :  { %266 = vsyncpa [#allocation6], 1 }
  0x31   :  { %267 = vsyncpa [#allocation4], 1 }

</bundles_post_ra>
